<compile_context>
chip_gen: v6e
topology: v6e:2x2x1
jax: 0.10.0
libtpu: 0.0.40
codegen_flags: <defaults>
</compile_context>

<pallas_src>
from functools import partial

import numpy as np
import jax
import jax.numpy as jnp
from jax.experimental import pallas as pl
from jax.experimental.pallas import tpu as pltpu


# ---------------------------------------------------------------------------
# Kernel 1: heatmap MSE loss (per-row-block partial numerator / denominator)
# ---------------------------------------------------------------------------
def _hm_mse_kernel(pred_ref, gt_ref, num_ref, den_ref, sq_acc, gt_acc, *,
                   n_rows, n_cols, tr, tc):
    j = pl.program_id(1)                          # column-block index (reduction axis)

    @pl.when(j == 0)
    def _init():
        sq_acc[...] = jnp.zeros_like(sq_acc)
        gt_acc[...] = jnp.zeros_like(gt_acc)

    pred = pred_ref[...].astype(jnp.float32)      # (TR, TC)
    gt = gt_ref[...].astype(jnp.float32)          # (TR, TC)

    diff2 = (pred - gt) ** 2
    if n_cols % tc != 0:                          # mask tail columns (static check)
        col_ids = j * tc + jax.lax.broadcasted_iota(jnp.int32, (tr, tc), 1)
        col_ok = col_ids < n_cols
        diff2 = jnp.where(col_ok, diff2, 0.0)
        gt = jnp.where(col_ok, gt, 0.0)

    sq_acc[...] += jnp.sum(diff2, axis=1, keepdims=True)   # (TR, 1)
    gt_acc[...] += jnp.sum(gt, axis=1, keepdims=True)      # (TR, 1)

    @pl.when(j == pl.num_programs(1) - 1)
    def _finalize():
        mse = sq_acc[...] * (1.0 / float(n_cols))           # mean over H*W per row
        hit = gt_acc[...] > 0.0                             # gt.sum(3).sum(2) > 0
        if n_rows % tr != 0:                                # mask tail rows
            row_ids = (pl.program_id(0) * tr
                       + jax.lax.broadcasted_iota(jnp.int32, (tr, 1), 0))
            hit = jnp.logical_and(hit, row_ids < n_rows)
        num_s = jnp.sum(jnp.where(hit, mse, 0.0))
        den_s = jnp.sum(hit.astype(jnp.float32))
        # broadcast partial scalar over a lane/sublane-aligned (8, 128) tile
        num_ref[...] = jnp.broadcast_to(num_s, (8, 128))
        den_ref[...] = jnp.broadcast_to(den_s, (8, 128))


def _choose_tiles(n_rows, n_cols, itemsize, budget_bytes=24 * 1024 * 1024):
    """Pick (row, col) block sizes for the MSE kernel.

    Pipelined working set = 2 inputs x 2 buffers x TR x TC x itemsize; keep it
    under `budget_bytes` so it fits scoped VMEM on every TPU generation
    (v7x only has 64 MiB physical VMEM)."""
    per_elem = 4 * itemsize                       # 2 inputs * 2 pipeline buffers
    rows_pad = ((n_rows + 7) // 8) * 8
    if 8 * n_cols * per_elem <= budget_bytes:
        tc = n_cols                               # full rows fit -> no column tiling
    else:
        tc = max(128, (budget_bytes // (8 * per_elem)) // 128 * 128)
    tr = max(8, (budget_bytes // (tc * per_elem)) // 8 * 8)
    tr = min(tr, 1024, rows_pad)
    return tr, tc


# ---------------------------------------------------------------------------
# Kernel 2: associative-embedding push / pull ('exp' loss type)
# ---------------------------------------------------------------------------
def _ae_kernel(tag_ref, vis_ref, push_ref, pull_ref):
    tags = tag_ref[...].astype(jnp.float32)       # (B, P, K)
    vis = vis_ref[...].astype(jnp.float32)        # (B, P, K)

    n = jnp.sum(vis, axis=2)                      # (B, P) visible joints per person
    valid = (n > 0).astype(jnp.float32)           # person contributes a tag
    safe_n = jnp.where(n > 0, n, 1.0)

    mean = jnp.sum(vis * tags, axis=2) / safe_n   # per-person mean tag
    d2 = (tags - mean[:, :, None]) ** 2
    pull_p = jnp.sum(vis * d2, axis=2) / safe_n   # torch.mean((tmp - mean)**2)

    pull_sum = jnp.sum(valid * pull_p, axis=1, keepdims=True)     # (B, 1)
    num_tags = jnp.sum(valid, axis=1, keepdims=True)              # (B, 1)

    # pairwise push: sum_{i,j valid} exp(-(t_i - t_j)^2) - num_tags
    diff = mean[:, :, None] - mean[:, None, :]                    # (B, P, P)
    pair_mask = valid[:, :, None] * valid[:, None, :]
    s = jnp.sum(jnp.exp(-(diff ** 2)) * pair_mask, axis=(1, 2)).reshape(-1, 1)

    denom = jnp.where(num_tags >= 2.0, (num_tags - 1.0) * num_tags, 1.0)
    push = jnp.where(num_tags >= 2.0, (s - num_tags) / denom * 0.5, 0.0)
    pull = jnp.where(num_tags >= 1.0,
                     pull_sum / jnp.where(num_tags >= 1.0, num_tags, 1.0), 0.0)

    push_ref[...] = push
    pull_ref[...] = pull


# ---------------------------------------------------------------------------
# Wrapper: Heatmap_AE_loss forward
# ---------------------------------------------------------------------------
def heatmap_ae_loss(outputs, heatmaps, joints, num_joints,
                    heatmaps_loss_factor=1.0, push_loss_factor=1.0,
                    pull_loss_factor=1.0):
    B, C, H, W = outputs.shape
    heatmaps_pred = outputs[:, :num_joints]                    # (B, J, H, W)
    tags_pred = outputs[:, num_joints:].reshape(B, -1)         # (B, C_tag*H*W)

    # ---------------- heatmap MSE loss (Pallas) ----------------
    BJ = B * num_joints
    HW = H * W
    itemsize = max(jnp.dtype(outputs.dtype).itemsize,
                   jnp.dtype(heatmaps.dtype).itemsize)
    TR, TC = _choose_tiles(BJ, HW, itemsize)
    G = pl.cdiv(BJ, TR)                                        # row blocks (parallel)
    CB = pl.cdiv(HW, TC)                                       # col blocks (reduction)

    # keep the narrow input dtype: no f32 upcast in the wrapper (kernel casts)
    pred2 = heatmaps_pred.reshape(BJ, HW)
    gt2 = heatmaps.reshape(BJ, HW)

    kernel = partial(_hm_mse_kernel, n_rows=BJ, n_cols=HW, tr=TR, tc=TC)
    num_part, den_part = pl.pallas_call(
        kernel,
        out_shape=(jax.ShapeDtypeStruct((G * 8, 128), jnp.float32),
                   jax.ShapeDtypeStruct((G * 8, 128), jnp.float32)),
        grid=(G, CB),
        in_specs=[pl.BlockSpec((TR, TC), lambda i, j: (i, j)),
                  pl.BlockSpec((TR, TC), lambda i, j: (i, j))],
        out_specs=[pl.BlockSpec((8, 128), lambda i, j: (i, 0)),
                   pl.BlockSpec((8, 128), lambda i, j: (i, 0))],
        scratch_shapes=[pltpu.VMEM((TR, 1), jnp.float32),
                        pltpu.VMEM((TR, 1), jnp.float32)],
        compiler_params=pltpu.CompilerParams(
            dimension_semantics=("parallel", "arbitrary"),
            vmem_limit_bytes=40 * 1024 * 1024),
    )(pred2, gt2)

    num_total = jnp.sum(num_part[::8, 0])                      # one partial per row block
    den_total = jnp.sum(den_part[::8, 0])
    heatmaps_loss = jnp.where(den_total > 0, num_total / den_total, 0.0)
    heatmaps_loss = heatmaps_loss * heatmaps_loss_factor

    # ---------------- AE push / pull loss (gather glue + Pallas) ----------------
    idx = joints[..., 0].astype(jnp.int32)                     # (B, P, K)
    vis = (joints[..., 1] > 0).astype(jnp.float32)             # (B, P, K)
    P, K = idx.shape[1], idx.shape[2]

    # data-dependent gather done in plain JAX (glue); compute stays in the kernel
    tag_vals = jnp.take_along_axis(tags_pred, idx.reshape(B, P * K),
                                   axis=1).reshape(B, P, K)

    # full-dim blocks: no zero-padding / extra HBM round trips needed
    push, pull = pl.pallas_call(
        _ae_kernel,
        out_shape=(jax.ShapeDtypeStruct((B, 1), jnp.float32),
                   jax.ShapeDtypeStruct((B, 1), jnp.float32)),
        grid=(1,),
        in_specs=[pl.BlockSpec((B, P, K), lambda i: (0, 0, 0)),
                  pl.BlockSpec((B, P, K), lambda i: (0, 0, 0))],
        out_specs=[pl.BlockSpec((B, 1), lambda i: (0, 0)),
                   pl.BlockSpec((B, 1), lambda i: (0, 0))],
    )(tag_vals, vis)

    push_loss = push[:, 0] * push_loss_factor
    pull_loss = pull[:, 0] * pull_loss_factor
    return heatmaps_loss, push_loss, pull_loss


# ---------------------------------------------------------------------------
# Pure-JAX reference (mirrors the PyTorch loops via masking) for verification
# ---------------------------------------------------------------------------
def reference(outputs, heatmaps, joints, num_joints):
    B, C, H, W = outputs.shape
    pred = outputs[:, :num_joints].astype(jnp.float32)
    gt = heatmaps.astype(jnp.float32)
    mask = (gt.sum(axis=(2, 3)) > 0).astype(jnp.float32)
    mse = ((pred - gt) ** 2).mean(axis=(2, 3))
    hm_loss = (mse * mask).sum() / mask.sum()

    tags_flat = outputs[:, num_joints:].reshape(B, -1)
    idx = joints[..., 0].astype(jnp.int32)
    vis = (joints[..., 1] > 0).astype(jnp.float32)
    P, K = idx.shape[1], idx.shape[2]
    tv = jnp.take_along_axis(tags_flat, idx.reshape(B, -1), axis=1).reshape(B, P, K)

    n = vis.sum(-1)
    valid = (n > 0).astype(jnp.float32)
    sn = jnp.where(n > 0, n, 1.0)
    m = (vis * tv).sum(-1) / sn
    pull_p = (vis * (tv - m[..., None]) ** 2).sum(-1) / sn
    pull_sum = (valid * pull_p).sum(-1)
    nt = valid.sum(-1)
    diff = m[:, :, None] - m[:, None, :]
    pm = valid[:, :, None] * valid[:, None, :]
    s = (jnp.exp(-diff ** 2) * pm).sum((1, 2))
    denom = jnp.where(nt >= 2, (nt - 1) * nt, 1.0)
    push = jnp.where(nt >= 2, (s - nt) / denom * 0.5, 0.0)
    pull = jnp.where(nt >= 1, pull_sum / jnp.where(nt >= 1, nt, 1.0), 0.0)
    return hm_loss, push, pull


if __name__ == "__main__":
    # small deterministic shapes: batch=2, num_joints=4, spatial=16x16,
    # tag channels = num_joints (so outputs has 2*num_joints channels),
    # max 3 people x 4 joints each.
    key = jax.random.PRNGKey(0)
    B, J, H, W = 2, 4, 16, 16
    C = 2 * J
    P, K = 3, 4

    k1, k2, k3, k4 = jax.random.split(key, 4)
    outputs = jax.random.uniform(k1, (B, C, H, W), dtype=jnp.float32)
    heatmaps = jax.random.uniform(k2, (B, J, H, W), dtype=jnp.float32)
    idx = jax.random.randint(k3, (B, P, K), 0, J * H * W, dtype=jnp.int32)
    vis = jax.random.bernoulli(k4, 0.7, (B, P, K)).astype(jnp.int32)
    joints = jnp.stack([idx, vis], axis=-1)                    # (B, P, K, 2)

    hm_loss, push_loss, pull_loss = heatmap_ae_loss(outputs, heatmaps, joints, J)
    jax.block_until_ready((hm_loss, push_loss, pull_loss))

    hm_ref, push_ref, pull_ref = reference(outputs, heatmaps, joints, J)
    np.testing.assert_allclose(np.asarray(hm_loss), np.asarray(hm_ref), rtol=1e-5, atol=1e-6)
    np.testing.assert_allclose(np.asarray(push_loss), np.asarray(push_ref), rtol=1e-5, atol=1e-6)
    np.testing.assert_allclose(np.asarray(pull_loss), np.asarray(pull_ref), rtol=1e-5, atol=1e-6)

    print("KERNEL_OK")
</pallas_src>

<mosaic_0001>
module attributes {stable_mosaic.version = 11 : i64} {
  func.func @_hm_mse_kernel(%arg0: i32, %arg1: i32, %arg2: memref<8x256xf32, #tpu.memory_space<vmem>>, %arg3: memref<8x256xf32, #tpu.memory_space<vmem>>, %arg4: memref<8x128xf32, #tpu.memory_space<vmem>>, %arg5: memref<8x128xf32, #tpu.memory_space<vmem>>, %arg6: memref<8x1xf32, #tpu.memory_space<vmem>>, %arg7: memref<8x1xf32, #tpu.memory_space<vmem>>) attributes {dimension_semantics = [#tpu.dimension_semantics<parallel>, #tpu.dimension_semantics<arbitrary>], iteration_bounds = array<i64: 1, 1>, scalar_prefetch = 0 : i64, scratch_operands = 2 : i64, tpu.core_type = #tpu.core_type<tc>, window_params = [{transform_indices = @transform_0, window_bounds = array<i64: 8, 256>}, {transform_indices = @transform_1, window_bounds = array<i64: 8, 256>}, {transform_indices = @transform_2, window_bounds = array<i64: 8, 128>}, {transform_indices = @transform_3, window_bounds = array<i64: 8, 128>}]} {
    %c0_i32 = arith.constant 0 : i32
    %0 = arith.cmpi eq, %arg1, %c0_i32 : i32
    %1 = arith.extui %0 : i1 to i32
    %c0_i32_0 = arith.constant 0 : i32
    %2 = arith.cmpi ne, %1, %c0_i32_0 : i32
    scf.if %2 {
      %cst_15 = arith.constant 0.000000e+00 : f32
      %20 = vector.broadcast %cst_15 : f32 to vector<8x1xf32>
      %c0_16 = arith.constant 0 : index
      %c0_17 = arith.constant 0 : index
      %21 = vector.load %arg6[%c0_16, %c0_17] : memref<8x1xf32, #tpu.memory_space<vmem>>, vector<8x1xf32>
      tpu.vector_store %arg6[%c0_16, %c0_17], %20 {strides = array<i32>} : memref<8x1xf32, #tpu.memory_space<vmem>>, vector<8x1xf32>,
      %cst_18 = arith.constant 0.000000e+00 : f32
      %22 = vector.broadcast %cst_18 : f32 to vector<8x1xf32>
      %c0_19 = arith.constant 0 : index
      %c0_20 = arith.constant 0 : index
      %23 = vector.load %arg7[%c0_19, %c0_20] : memref<8x1xf32, #tpu.memory_space<vmem>>, vector<8x1xf32>
      tpu.vector_store %arg7[%c0_19, %c0_20], %22 {strides = array<i32>} : memref<8x1xf32, #tpu.memory_space<vmem>>, vector<8x1xf32>,
    } else {
    }
    %c0 = arith.constant 0 : index
    %c0_1 = arith.constant 0 : index
    %3 = vector.load %arg2[%c0, %c0_1] : memref<8x256xf32, #tpu.memory_space<vmem>>, vector<8x256xf32>
    %c0_2 = arith.constant 0 : index
    %c0_3 = arith.constant 0 : index
    %4 = vector.load %arg3[%c0_2, %c0_3] : memref<8x256xf32, #tpu.memory_space<vmem>>, vector<8x256xf32>
    %5 = arith.subf %3, %4 : vector<8x256xf32>
    %6 = arith.mulf %5, %5 : vector<8x256xf32>
    %c0_4 = arith.constant 0 : index
    %c0_5 = arith.constant 0 : index
    %7 = vector.load %arg6[%c0_4, %c0_5] : memref<8x1xf32, #tpu.memory_space<vmem>>, vector<8x1xf32>
    %cst = arith.constant dense<0.000000e+00> : vector<8xf32>
    %8 = vector.multi_reduction <add>, %6, %cst [1] : vector<8x256xf32> to vector<8xf32>
    %9 = vector.shape_cast %8 : vector<8xf32> to vector<8x1xf32>
    %10 = arith.addf %7, %9 : vector<8x1xf32>
    %c0_6 = arith.constant 0 : index
    %c0_7 = arith.constant 0 : index
    %11 = vector.load %arg6[%c0_6, %c0_7] : memref<8x1xf32, #tpu.memory_space<vmem>>, vector<8x1xf32>
    tpu.vector_store %arg6[%c0_6, %c0_7], %10 {strides = array<i32>} : memref<8x1xf32, #tpu.memory_space<vmem>>, vector<8x1xf32>,
    %c0_8 = arith.constant 0 : index
    %c0_9 = arith.constant 0 : index
    %12 = vector.load %arg7[%c0_8, %c0_9] : memref<8x1xf32, #tpu.memory_space<vmem>>, vector<8x1xf32>
    %cst_10 = arith.constant dense<0.000000e+00> : vector<8xf32>
    %13 = vector.multi_reduction <add>, %4, %cst_10 [1] : vector<8x256xf32> to vector<8xf32>
    %14 = vector.shape_cast %13 : vector<8xf32> to vector<8x1xf32>
    %15 = arith.addf %12, %14 : vector<8x1xf32>
    %c0_11 = arith.constant 0 : index
    %c0_12 = arith.constant 0 : index
    %16 = vector.load %arg7[%c0_11, %c0_12] : memref<8x1xf32, #tpu.memory_space<vmem>>, vector<8x1xf32>
    tpu.vector_store %arg7[%c0_11, %c0_12], %15 {strides = array<i32>} : memref<8x1xf32, #tpu.memory_space<vmem>>, vector<8x1xf32>,
    %c0_i32_13 = arith.constant 0 : i32
    %17 = arith.cmpi eq, %arg1, %c0_i32_13 : i32
    %18 = arith.extui %17 : i1 to i32
    %c0_i32_14 = arith.constant 0 : i32
    %19 = arith.cmpi ne, %18, %c0_i32_14 : i32
    scf.if %19 {
      %c0_15 = arith.constant 0 : index
      %c0_16 = arith.constant 0 : index
      %20 = vector.load %arg6[%c0_15, %c0_16] : memref<8x1xf32, #tpu.memory_space<vmem>>, vector<8x1xf32>
      %cst_17 = arith.constant 3.906250e-03 : f32
      %21 = vector.broadcast %cst_17 : f32 to vector<8x1xf32>
      %22 = arith.mulf %20, %21 : vector<8x1xf32>
      %c0_18 = arith.constant 0 : index
      %c0_19 = arith.constant 0 : index
      %23 = vector.load %arg7[%c0_18, %c0_19] : memref<8x1xf32, #tpu.memory_space<vmem>>, vector<8x1xf32>
      %cst_20 = arith.constant 0.000000e+00 : f32
      %24 = vector.broadcast %cst_20 : f32 to vector<8x1xf32>
      %25 = arith.cmpf ogt, %23, %24 : vector<8x1xf32>
      %cst_21 = arith.constant 0.000000e+00 : f32
      %26 = vector.broadcast %cst_21 : f32 to vector<8x1xf32>
      %27 = arith.select %25, %22, %26 : vector<8x1xi1>, vector<8x1xf32>
      %28 = vector.shape_cast %27 : vector<8x1xf32> to vector<1x8x1xf32>
      %cst_22 = arith.constant dense<0.000000e+00> : vector<1xf32>
      %29 = vector.multi_reduction <add>, %28, %cst_22 [1, 2] : vector<1x8x1xf32> to vector<1xf32>
      %30 = vector.shape_cast %29 : vector<1xf32> to vector<1x1x1xf32>
      %31 = vector.extract %30[0, 0, 0] : f32 from vector<1x1x1xf32>
      %32 = arith.extui %25 : vector<8x1xi1> to vector<8x1xi32>
      %33 = arith.sitofp %32 : vector<8x1xi32> to vector<8x1xf32>
      %34 = vector.shape_cast %33 : vector<8x1xf32> to vector<1x8x1xf32>
      %cst_23 = arith.constant dense<0.000000e+00> : vector<1xf32>
      %35 = vector.multi_reduction <add>, %34, %cst_23 [1, 2] : vector<1x8x1xf32> to vector<1xf32>
      %36 = vector.shape_cast %35 : vector<1xf32> to vector<1x1x1xf32>
      %37 = vector.extract %36[0, 0, 0] : f32 from vector<1x1x1xf32>
      %38 = vector.broadcast %31 : f32 to vector<8x128xf32>
      %c0_24 = arith.constant 0 : index
      %c0_25 = arith.constant 0 : index
      %39 = vector.load %arg4[%c0_24, %c0_25] : memref<8x128xf32, #tpu.memory_space<vmem>>, vector<8x128xf32>
      tpu.vector_store %arg4[%c0_24, %c0_25], %38 {strides = array<i32>} : memref<8x128xf32, #tpu.memory_space<vmem>>, vector<8x128xf32>,
      %40 = vector.broadcast %37 : f32 to vector<8x128xf32>
      %c0_26 = arith.constant 0 : index
      %c0_27 = arith.constant 0 : index
      %41 = vector.load %arg5[%c0_26, %c0_27] : memref<8x128xf32, #tpu.memory_space<vmem>>, vector<8x128xf32>
      tpu.vector_store %arg5[%c0_26, %c0_27], %40 {strides = array<i32>} : memref<8x128xf32, #tpu.memory_space<vmem>>, vector<8x128xf32>,
    } else {
    }
    return
  }
  func.func @transform_0(%arg0: i32, %arg1: i32) -> (i32, i32) {
    %c0_i32 = arith.constant 0 : i32
    return %arg0, %arg1 : i32, i32
  }
  func.func @transform_1(%arg0: i32, %arg1: i32) -> (i32, i32) {
    %c0_i32 = arith.constant 0 : i32
    return %arg0, %arg1 : i32, i32
  }
  func.func @transform_2(%arg0: i32, %arg1: i32) -> (i32, i32) {
    %c0_i32 = arith.constant 0 : i32
    %c0_i32_0 = arith.constant 0 : i32
    return %arg0, %c0_i32 : i32, i32
  }
  func.func @transform_3(%arg0: i32, %arg1: i32) -> (i32, i32) {
    %c0_i32 = arith.constant 0 : i32
    %c0_i32_0 = arith.constant 0 : i32
    return %arg0, %c0_i32 : i32, i32
  }
}

</mosaic_0001>

<bundles_post_ra>
// kernel: tpu_custom_call.1
= control target key start
LH: loop header
LB: loop body
LE: loop exit
PB: predicated region body
PF: predicated region fallthrough
CT: control target
= control target key end

     0   :  { %9 = vsyncpa [#allocation5], 0  ;;  %s272_s0 = inlined_call_operand.hbm [shape: f32[8,256], index: 0, kind: input, shape index: {}]   ;;  %s273_s1 = inlined_call_operand.hbm [shape: f32[8,256], index: 1, kind: input, shape index: {}]   ;;  %s274_s2 = inlined_call_operand.hbm [shape: f32[8,128], index: 2, kind: output, shape index: {0}]   ;;  %s275_s3 = inlined_call_operand.hbm [shape: f32[8,128], index: 3, kind: output, shape index: {1}]  }
   0x1   :  { %10 = vsyncpa [#allocation8], 0 }
   0x2   :  { %11 = vsyncpa [#allocation6], 0 }
   0x3   :  { %12 = vsyncpa [#allocation11], 0  ;;  %s229_s12 = smov [#allocation4]   ;;  %s230_s14 = smov [#allocation7]  }
   0x4   :  { %s19_s13 = sshll.u32 %s229_s12, 4  ;;  %s29_s15 = sshll.u32 %s230_s14, 4  ;;  %s20_s13 = int_to_ptr.vmem [resolvable:$true] %s19_s13  ;;  %s30_s15 = int_to_ptr.vmem [resolvable:$true] %s29_s15 }
   0x5   :  { %s149_s16 = scalar_lea.vmem %s20_s13, 256  ;;  %p154_p1 = scmp.lt.s32.totalorder %s20_s13, %s20_s13 }
   0x6   :  { %p150_p0 = scmp.ne.s32.totalorder %s20_s13, %s149_s16  ;;  %p155_p2 = scmp.lt.s32.totalorder %s149_s16, %s149_s16 }
   0x8   :  { %p156_p3 = por %p155_p2, %p154_p1 }
   0xa   :  { %p157_p4 = pnand %p156_p3, %p150_p0 }
   0xc   :  { %160 = shalt.err (!%p157_p4)
}
   0xd   :  { %22 = dma.hbm_to_vmem [thread:$0]  %s272_s0, 256, %s20_s13, [#allocation5]  }
   0xe   :  { %s169_s19 = scalar_lea.vmem %s30_s15, 256  ;;  %p174_p6 = scmp.lt.s32.totalorder %s30_s15, %s30_s15 }
   0xf   :  { %p170_p5 = scmp.ne.s32.totalorder %s30_s15, %s169_s19  ;;  %p175_p7 = scmp.lt.s32.totalorder %s169_s19, %s169_s19 }
  0x11   :  { %p176_p8 = por %p175_p7, %p174_p6 }
  0x13   :  { %p177_p9 = pnand %p176_p8, %p170_p5 }
  0x15   :  { %180 = shalt.err (!%p177_p9)
}
  0x16   :  { %32 = dma.hbm_to_vmem [thread:$0]  %s273_s1, 256, %s30_s15, [#allocation8]  }
  0x17   :  { %221 = dma.done.wait [#allocation5], 256  }
  0x18   :  { %222 = vsyncadd [#allocation5], 4294967040 }
  0x19   :  { %223 = dma.done.wait [#allocation8], 256  }
  0x1a   :  { %224 = vsyncadd [#allocation8], 4294967040  ;;  %vm43_vm0 = vcmask 7168   ;;  %v231_v0 = vmov 0.0   ;;  %v46_v1 = vld [vmem:[#allocation4] sm:$0xff]  ;;  %v47_v2 = vld [vmem:[#allocation4 + $0x8] sm:$0xff] }
  0x1b   :  { %44 = vst.msk [vmem:[#allocation2] sm:$0xff] %vm43_vm0, %v231_v0  ;;  %45 = vst.msk [vmem:[#allocation3] sm:$0xff] %vm43_vm0, %v231_v0  ;;  %v48_v3 = vld [vmem:[#allocation7] sm:$0xff]  ;;  %v49_v4 = vld [vmem:[#allocation7 + $0x8] sm:$0xff]  ;;  %s232_s0 = smov [#allocation9]   ;;  %s233_s23 = smov [#allocation10]  }
  0x1c   :  { %v50_v5 = vsub.f32 %v46_v1, %v48_v3  ;;  %v51_v6 = vsub.f32 %v47_v2, %v49_v4  ;;  %v62_v10 = vadd.f32 %v49_v4, %v48_v3  ;;  %s107_s1 = sshll.u32 %s232_s0, 4  ;;  %s117_s24 = sshll.u32 %s233_s23, 4  ;;  %s108_s1 = int_to_ptr.vmem [resolvable:$true] %s107_s1  ;;  %s118_s24 = int_to_ptr.vmem [resolvable:$true] %s117_s24 }
  0x1d   :  { %s181_s25 = scalar_lea.vmem %s108_s1, 128  ;;  %p186_p11 = scmp.lt.s32.totalorder %s108_s1, %s108_s1 }
  0x1e   :  { %v52_v7 = vmul.f32 %v50_v5, %v50_v5  ;;  %v53_v8 = vmul.f32 %v51_v6, %v51_v6  ;;  %p182_p10 = scmp.ne.s32.totalorder %s108_s1, %s181_s25  ;;  %p187_p12 = scmp.lt.s32.totalorder %s181_s25, %s181_s25 }
  0x20   :  { %v55_v9 = vadd.f32 %v53_v8, %v52_v7  ;;  %p188_p13 = por %p187_p12, %p186_p11 }
  0x22   :  { %56 = vadd.xlane.f32.xlu0 %v55_v9  ;;  %v54_v11 = vld [vmem:[#allocation2] sm:$0xff]  ;;  %v61_v14 = vld [vmem:[#allocation3] sm:$0xff]  ;;  %p189_p0 = pnand %p188_p13, %p182_p10 }
  0x26   :  { %63 = vadd.xlane.f32.xlu0 %v62_v10 }
  0xab   :  { %v57_v12 = vpop.xlane.xlu0 %56 }
  0xac   :  { %v58_v13 = vadd.f32 %v57_v12, %v54_v11 }
  0xae   :  { %60 = vst.msk [vmem:[#allocation2] sm:$0xff] %vm43_vm0, %v58_v13 }
  0xaf   :  { %v64_v15 = vpop.xlane.xlu0 %63 }
  0xb0   :  { %v65_v16 = vadd.f32 %v64_v15, %v61_v14 }
  0xb2   :  { %66 = vst.msk [vmem:[#allocation3] sm:$0xff] %vm43_vm0, %v65_v16 }
  0xb5   :  { %v70_v17 = vld [vmem:[#allocation2] sm:$0xff] }
  0xb6   :  { %v71_v18 = vmul.f32 0.00390625, %v70_v17 }
  0xb9   :  { %v72_v19 = vld [vmem:[#allocation3] sm:$0xff] }
  0xba   :  { %vm73_vm1 = vcmp.gt.f32.partialorder %v72_v19, 0.0 }
  0xbb   :  { %v74_v20 = vsel %vm73_vm1, %v71_v18, 0.0  ;;  %v131_v22 = vsel %vm73_vm1, 1.0, %v231_v0 }
  0xbc   :  { %v75_v21 = vsel %vm43_vm0, %v74_v20, 0.0  ;;  %v87_v23 = vsel %vm43_vm0, %v131_v22, 0.0 }
  0xbd   :  { %76 = vadd.xlane.f32.xlu1 %v75_v21 }
  0xc1   :  { %88 = vadd.xlane.f32.xlu1 %v87_v23 }
 0x146   :  { %v77_v24 = vpop.xlane.xlu1 %76 }
 0x147   :  { %v78_v25 = vrot.slane %v77_v24, 4 }
 0x149   :  { %v79_v26 = vadd.f32 %v78_v25, %v77_v24 }
 0x14a   :  { %v89_v27 = vpop.xlane.xlu1 %88 }
 0x14b   :  { %v80_v28 = vrot.slane %v79_v26, 2  ;;  %v90_v29 = vrot.slane %v89_v27, 4 }
 0x14d   :  { %v91_v30 = vadd.f32 %v90_v29, %v89_v27  ;;  %v81_v31 = vadd.f32 %v80_v28, %v79_v26 }
 0x14f   :  { %v92_v32 = vrot.slane %v91_v30, 2  ;;  %v82_v33 = vrot.slane %v81_v31, 1 }
 0x151   :  { %v93_v34 = vadd.f32 %v92_v32, %v91_v30  ;;  %v83_v35 = vadd.f32 %v82_v33, %v81_v31 }
 0x153   :  { %132 = vpush %v83_v35  ;;  %v94_v36 = vrot.slane %v93_v34, 1 }
 0x155   :  { %v95_v37 = vadd.f32 %v94_v36, %v93_v34 }
 0x157   :  { %134 = vpush %v95_v37 }
 0x184   :  { %s133_s22 = spop %132 }
 0x185   :  { %v97_v38 = vstv %s133_s22 }
 0x186   :  { %98 = vst [vmem:[#allocation9] sm:$0xff] %v97_v38 }
 0x187   :  { %192 = shalt.err (!%p189_p0)
}
 0x188   :  { %110 = dma.vmem_to_hbm [thread:$0]  %s108_s1, 128, %s274_s2, [#allocation6]  }
 0x189   :  { %s135_s28 = spop %134  ;;  %s201_s29 = scalar_lea.vmem %s118_s24, 128 }
 0x18a   :  { %v99_v39 = vstv %s135_s28  ;;  %p202_p1 = scmp.ne.s32.totalorder %s118_s24, %s201_s29  ;;  %p206_p2 = scmp.lt.s32.totalorder %s118_s24, %s118_s24 }
 0x18b   :  { %100 = vst [vmem:[#allocation10] sm:$0xff] %v99_v39  ;;  %p207_p3 = scmp.lt.s32.totalorder %s201_s29, %s201_s29 }
 0x18d   :  { %p208_p4 = por %p207_p3, %p206_p2 }
 0x18f   :  { %p209_p5 = pnand %p208_p4, %p202_p1 }
 0x191   :  { %212 = shalt.err (!%p209_p5)
}
 0x192   :  { %120 = dma.vmem_to_hbm [thread:$0]  %s118_s24, 128, %s275_s3, [#allocation11]  }
 0x193   :  { %225 = dma.done.wait [#allocation6], 128  }
 0x194   :  { %226 = vsyncadd [#allocation6], 4294967168 }
 0x195   :  { %227 = dma.done.wait [#allocation11], 128  }
 0x196   :  { %228 = vsyncadd [#allocation11], 4294967168 }
 0x197   :  { %127 = vsyncpa [#allocation5], 1 }
 0x198   :  { %128 = vsyncpa [#allocation8], 1 }
 0x199   :  { %129 = vsyncpa [#allocation6], 1 }
 0x19a   :  { %130 = vsyncpa [#allocation11], 1 }

</bundles_post_ra>
